<compile_context>
chip_gen: v7x
topology: tpu7x:2x2x1
jax: 0.10.0
libtpu: 0.0.40
codegen_flags: <defaults>
</compile_context>

<pallas_src>
import functools
import math

import jax
import jax.numpy as jnp
from jax.experimental import pallas as pl
from jax.experimental.pallas import tpu as pltpu

_LANES = 128


def _round_up(x: int, m: int) -> int:
    return ((x + m - 1) // m) * m


def _bessel_kernel(d_ref, o_ref, *, num_rbf: int, cutoff: float):
    # d_ref: (tile_rows, 128)            distances, lane-dense
    # o_ref: (num_rbf, tile_rows, 128)   o_ref[k] is one dense full-width tile
    d = d_ref[...]                                   # f32 (tile_rows, 128)
    f1 = math.pi / cutoff                            # fundamental frequency

    # One sin + one cos per distance; the C1 cutoff cosine IS cos(f1*d).
    c1 = jnp.cos(d * f1)
    s1 = jnp.sin(d * f1)

    mask = (d < cutoff).astype(d.dtype)              # strict <, as in PyTorch
    f_cut = 0.5 * (c1 + 1.0) * mask

    # Per-distance reciprocal on the EUP; one Newton step restores f32 accuracy
    # so the 1e-5-level match with the reference is preserved.
    safe = d + 1e-8
    recip = pl.reciprocal(safe, approx=True)
    recip = recip * (2.0 - safe * recip)
    scale = f_cut * recip                            # (tile_rows, 128)

    # Chebyshev recurrence over rbf channels (unrolled, pure VPU FMAs).
    two_c1 = 2.0 * c1
    s_prev = jnp.zeros_like(d)                       # sin(f_0 * d) = 0
    s_cur = s1                                       # sin(f_1 * d)
    for k in range(num_rbf):
        o_ref[k, :, :] = s_cur * scale
        s_prev, s_cur = s_cur, two_c1 * s_cur - s_prev


def bessel_basis(distances: jax.Array, num_rbf: int, cutoff: float,
                 tile_rows: int = 512) -> jax.Array:
    """Bessel basis of a 1-D array of distances.

    distances: shape (E,), any float dtype
    returns:   shape (E, num_rbf), float32 — matches the PyTorch forward.
    """
    E = distances.shape[0]
    d = distances.astype(jnp.float32)

    rows = pl.cdiv(E, _LANES)                        # number of 128-wide rows
    tile_rows = _round_up(max(8, tile_rows), 8)
    tile_rows = min(tile_rows, _round_up(rows, 8))   # clamp for tiny inputs
    rows_pad = _round_up(rows, tile_rows)
    e_pad = rows_pad * _LANES
    if e_pad != E:
        d = jnp.pad(d, (0, e_pad - E))               # d=0 padding -> output 0
    d2 = d.reshape(rows_pad, _LANES)

    grid = (rows_pad // tile_rows,)
    kernel = functools.partial(_bessel_kernel, num_rbf=num_rbf, cutoff=cutoff)

    out = pl.pallas_call(
        kernel,
        out_shape=jax.ShapeDtypeStruct((num_rbf, rows_pad, _LANES), jnp.float32),
        grid_spec=pltpu.PrefetchScalarGridSpec(
            num_scalar_prefetch=0,
            grid=grid,
            in_specs=[
                pl.BlockSpec((tile_rows, _LANES), lambda i: (i, 0)),
            ],
            out_specs=pl.BlockSpec((num_rbf, tile_rows, _LANES),
                                   lambda i: (0, i, 0)),
        ),
        compiler_params=pltpu.CompilerParams(
            dimension_semantics=("parallel",)),
    )(d2)

    # (num_rbf, rows_pad, 128) -> (E, num_rbf): layout plumbing, outside kernel.
    out = jnp.transpose(out, (1, 2, 0)).reshape(rows_pad * _LANES, num_rbf)
    return out[:E]


def bessel_basis_ref(distances: jax.Array, num_rbf: int, cutoff: float) -> jax.Array:
    """Pure-JAX reference mirroring the PyTorch forward exactly."""
    freqs = jnp.arange(1, num_rbf + 1, dtype=jnp.float32) * (math.pi / cutoff)
    d = distances.astype(jnp.float32)[..., None]
    mask = (d < cutoff).astype(jnp.float32)
    f_cut = 0.5 * (jnp.cos(d * math.pi / cutoff) + 1.0) * mask
    safe = d + 1e-8
    bessel = jnp.sin(freqs * d) / safe
    return bessel * f_cut


if __name__ == "__main__":
    key = jax.random.PRNGKey(0)
    E = 300            # deliberately not a multiple of 128 (exercises padding)
    num_rbf = 16
    cutoff = 5.0

    # distances in [0, cutoff*1.2) so some exceed the cutoff (tests the mask)
    distances = jax.random.uniform(key, (E,), dtype=jnp.float32,
                                   minval=0.0, maxval=cutoff * 1.2)

    out = bessel_basis(distances, num_rbf, cutoff)
    out = jax.block_until_ready(out)

    ref = bessel_basis_ref(distances, num_rbf, cutoff)
    assert out.shape == (E, num_rbf)
    # Chebyshev recurrence + Newton-refined reciprocal accumulate a few f32 ulps
    # relative to the per-element sin reference; keep a tight but safe tolerance.
    assert jnp.allclose(out, ref, atol=5e-5, rtol=1e-5), "mismatch vs reference"

    print("KERNEL_OK")
</pallas_src>

<mosaic_0001>
module attributes {stable_mosaic.version = 11 : i64} {
  func.func @_bessel_kernel(%arg0: i32, %arg1: memref<8x128xf32, #tpu.memory_space<vmem>>, %arg2: memref<16x8x128xf32, #tpu.memory_space<vmem>>) attributes {dimension_semantics = [#tpu.dimension_semantics<parallel>], iteration_bounds = array<i64: 1>, scalar_prefetch = 0 : i64, scratch_operands = 0 : i64, tpu.core_type = #tpu.core_type<tc>, window_params = [{transform_indices = @transform_0, window_bounds = array<i64: 8, 128>}, {transform_indices = @transform_1, window_bounds = array<i64: 16, 8, 128>}]} {
    %c0 = arith.constant 0 : index
    %c0_0 = arith.constant 0 : index
    %0 = vector.load %arg1[%c0, %c0_0] : memref<8x128xf32, #tpu.memory_space<vmem>>, vector<8x128xf32>
    %cst = arith.constant 0.628318548 : f32
    %1 = vector.broadcast %cst : f32 to vector<8x128xf32>
    %2 = arith.mulf %0, %1 : vector<8x128xf32>
    %3 = math.cos %2 : vector<8x128xf32>
    %cst_1 = arith.constant 0.628318548 : f32
    %4 = vector.broadcast %cst_1 : f32 to vector<8x128xf32>
    %5 = arith.mulf %0, %4 : vector<8x128xf32>
    %6 = math.sin %5 : vector<8x128xf32>
    %cst_2 = arith.constant 5.000000e+00 : f32
    %7 = vector.broadcast %cst_2 : f32 to vector<8x128xf32>
    %8 = arith.cmpf olt, %0, %7 : vector<8x128xf32>
    %9 = arith.extui %8 : vector<8x128xi1> to vector<8x128xi32>
    %10 = arith.sitofp %9 : vector<8x128xi32> to vector<8x128xf32>
    %cst_3 = arith.constant 1.000000e+00 : f32
    %11 = vector.broadcast %cst_3 : f32 to vector<8x128xf32>
    %12 = arith.addf %3, %11 : vector<8x128xf32>
    %cst_4 = arith.constant 5.000000e-01 : f32
    %13 = vector.broadcast %cst_4 : f32 to vector<8x128xf32>
    %14 = arith.mulf %13, %12 : vector<8x128xf32>
    %15 = arith.mulf %14, %10 : vector<8x128xf32>
    %cst_5 = arith.constant 9.99999993E-9 : f32
    %16 = vector.broadcast %cst_5 : f32 to vector<8x128xf32>
    %17 = arith.addf %0, %16 : vector<8x128xf32>
    %18 = tpu.reciprocal %17 {approx = true} : vector<8x128xf32> -> vector<8x128xf32>
    %19 = arith.mulf %17, %18 : vector<8x128xf32>
    %cst_6 = arith.constant 2.000000e+00 : f32
    %20 = vector.broadcast %cst_6 : f32 to vector<8x128xf32>
    %21 = arith.subf %20, %19 : vector<8x128xf32>
    %22 = arith.mulf %18, %21 : vector<8x128xf32>
    %23 = arith.mulf %15, %22 : vector<8x128xf32>
    %cst_7 = arith.constant 2.000000e+00 : f32
    %24 = vector.broadcast %cst_7 : f32 to vector<8x128xf32>
    %25 = arith.mulf %24, %3 : vector<8x128xf32>
    %cst_8 = arith.constant 0.000000e+00 : f32
    %26 = vector.broadcast %cst_8 : f32 to vector<8x128xf32>
    %27 = arith.mulf %6, %23 : vector<8x128xf32>
    %c0_9 = arith.constant 0 : index
    %c0_10 = arith.constant 0 : index
    %c0_11 = arith.constant 0 : index
    %28 = vector.load %arg2[%c0_9, %c0_10, %c0_11] : memref<16x8x128xf32, #tpu.memory_space<vmem>>, vector<1x8x128xf32>
    %29 = vector.shape_cast %28 : vector<1x8x128xf32> to vector<8x128xf32>
    %30 = vector.shape_cast %27 : vector<8x128xf32> to vector<1x8x128xf32>
    tpu.vector_store %arg2[%c0_9, %c0_10, %c0_11], %30 {strides = array<i32>} : memref<16x8x128xf32, #tpu.memory_space<vmem>>, vector<1x8x128xf32>,
    %31 = arith.mulf %25, %6 : vector<8x128xf32>
    %32 = arith.subf %31, %26 : vector<8x128xf32>
    %33 = arith.mulf %32, %23 : vector<8x128xf32>
    %c1 = arith.constant 1 : index
    %c0_12 = arith.constant 0 : index
    %c0_13 = arith.constant 0 : index
    %34 = vector.load %arg2[%c1, %c0_12, %c0_13] : memref<16x8x128xf32, #tpu.memory_space<vmem>>, vector<1x8x128xf32>
    %35 = vector.shape_cast %34 : vector<1x8x128xf32> to vector<8x128xf32>
    %36 = vector.shape_cast %33 : vector<8x128xf32> to vector<1x8x128xf32>
    tpu.vector_store %arg2[%c1, %c0_12, %c0_13], %36 {strides = array<i32>} : memref<16x8x128xf32, #tpu.memory_space<vmem>>, vector<1x8x128xf32>,
    %37 = arith.mulf %25, %32 : vector<8x128xf32>
    %38 = arith.subf %37, %6 : vector<8x128xf32>
    %39 = arith.mulf %38, %23 : vector<8x128xf32>
    %c2 = arith.constant 2 : index
    %c0_14 = arith.constant 0 : index
    %c0_15 = arith.constant 0 : index
    %40 = vector.load %arg2[%c2, %c0_14, %c0_15] : memref<16x8x128xf32, #tpu.memory_space<vmem>>, vector<1x8x128xf32>
    %41 = vector.shape_cast %40 : vector<1x8x128xf32> to vector<8x128xf32>
    %42 = vector.shape_cast %39 : vector<8x128xf32> to vector<1x8x128xf32>
    tpu.vector_store %arg2[%c2, %c0_14, %c0_15], %42 {strides = array<i32>} : memref<16x8x128xf32, #tpu.memory_space<vmem>>, vector<1x8x128xf32>,
    %43 = arith.mulf %25, %38 : vector<8x128xf32>
    %44 = arith.subf %43, %32 : vector<8x128xf32>
    %45 = arith.mulf %44, %23 : vector<8x128xf32>
    %c3 = arith.constant 3 : index
    %c0_16 = arith.constant 0 : index
    %c0_17 = arith.constant 0 : index
    %46 = vector.load %arg2[%c3, %c0_16, %c0_17] : memref<16x8x128xf32, #tpu.memory_space<vmem>>, vector<1x8x128xf32>
    %47 = vector.shape_cast %46 : vector<1x8x128xf32> to vector<8x128xf32>
    %48 = vector.shape_cast %45 : vector<8x128xf32> to vector<1x8x128xf32>
    tpu.vector_store %arg2[%c3, %c0_16, %c0_17], %48 {strides = array<i32>} : memref<16x8x128xf32, #tpu.memory_space<vmem>>, vector<1x8x128xf32>,
    %49 = arith.mulf %25, %44 : vector<8x128xf32>
    %50 = arith.subf %49, %38 : vector<8x128xf32>
    %51 = arith.mulf %50, %23 : vector<8x128xf32>
    %c4 = arith.constant 4 : index
    %c0_18 = arith.constant 0 : index
    %c0_19 = arith.constant 0 : index
    %52 = vector.load %arg2[%c4, %c0_18, %c0_19] : memref<16x8x128xf32, #tpu.memory_space<vmem>>, vector<1x8x128xf32>
    %53 = vector.shape_cast %52 : vector<1x8x128xf32> to vector<8x128xf32>
    %54 = vector.shape_cast %51 : vector<8x128xf32> to vector<1x8x128xf32>
    tpu.vector_store %arg2[%c4, %c0_18, %c0_19], %54 {strides = array<i32>} : memref<16x8x128xf32, #tpu.memory_space<vmem>>, vector<1x8x128xf32>,
    %55 = arith.mulf %25, %50 : vector<8x128xf32>
    %56 = arith.subf %55, %44 : vector<8x128xf32>
    %57 = arith.mulf %56, %23 : vector<8x128xf32>
    %c5 = arith.constant 5 : index
    %c0_20 = arith.constant 0 : index
    %c0_21 = arith.constant 0 : index
    %58 = vector.load %arg2[%c5, %c0_20, %c0_21] : memref<16x8x128xf32, #tpu.memory_space<vmem>>, vector<1x8x128xf32>
    %59 = vector.shape_cast %58 : vector<1x8x128xf32> to vector<8x128xf32>
    %60 = vector.shape_cast %57 : vector<8x128xf32> to vector<1x8x128xf32>
    tpu.vector_store %arg2[%c5, %c0_20, %c0_21], %60 {strides = array<i32>} : memref<16x8x128xf32, #tpu.memory_space<vmem>>, vector<1x8x128xf32>,
    %61 = arith.mulf %25, %56 : vector<8x128xf32>
    %62 = arith.subf %61, %50 : vector<8x128xf32>
    %63 = arith.mulf %62, %23 : vector<8x128xf32>
    %c6 = arith.constant 6 : index
    %c0_22 = arith.constant 0 : index
    %c0_23 = arith.constant 0 : index
    %64 = vector.load %arg2[%c6, %c0_22, %c0_23] : memref<16x8x128xf32, #tpu.memory_space<vmem>>, vector<1x8x128xf32>
    %65 = vector.shape_cast %64 : vector<1x8x128xf32> to vector<8x128xf32>
    %66 = vector.shape_cast %63 : vector<8x128xf32> to vector<1x8x128xf32>
    tpu.vector_store %arg2[%c6, %c0_22, %c0_23], %66 {strides = array<i32>} : memref<16x8x128xf32, #tpu.memory_space<vmem>>, vector<1x8x128xf32>,
    %67 = arith.mulf %25, %62 : vector<8x128xf32>
    %68 = arith.subf %67, %56 : vector<8x128xf32>
    %69 = arith.mulf %68, %23 : vector<8x128xf32>
    %c7 = arith.constant 7 : index
    %c0_24 = arith.constant 0 : index
    %c0_25 = arith.constant 0 : index
    %70 = vector.load %arg2[%c7, %c0_24, %c0_25] : memref<16x8x128xf32, #tpu.memory_space<vmem>>, vector<1x8x128xf32>
    %71 = vector.shape_cast %70 : vector<1x8x128xf32> to vector<8x128xf32>
    %72 = vector.shape_cast %69 : vector<8x128xf32> to vector<1x8x128xf32>
    tpu.vector_store %arg2[%c7, %c0_24, %c0_25], %72 {strides = array<i32>} : memref<16x8x128xf32, #tpu.memory_space<vmem>>, vector<1x8x128xf32>,
    %73 = arith.mulf %25, %68 : vector<8x128xf32>
    %74 = arith.subf %73, %62 : vector<8x128xf32>
    %75 = arith.mulf %74, %23 : vector<8x128xf32>
    %c8 = arith.constant 8 : index
    %c0_26 = arith.constant 0 : index
    %c0_27 = arith.constant 0 : index
    %76 = vector.load %arg2[%c8, %c0_26, %c0_27] : memref<16x8x128xf32, #tpu.memory_space<vmem>>, vector<1x8x128xf32>
    %77 = vector.shape_cast %76 : vector<1x8x128xf32> to vector<8x128xf32>
    %78 = vector.shape_cast %75 : vector<8x128xf32> to vector<1x8x128xf32>
    tpu.vector_store %arg2[%c8, %c0_26, %c0_27], %78 {strides = array<i32>} : memref<16x8x128xf32, #tpu.memory_space<vmem>>, vector<1x8x128xf32>,
    %79 = arith.mulf %25, %74 : vector<8x128xf32>
    %80 = arith.subf %79, %68 : vector<8x128xf32>
    %81 = arith.mulf %80, %23 : vector<8x128xf32>
    %c9 = arith.constant 9 : index
    %c0_28 = arith.constant 0 : index
    %c0_29 = arith.constant 0 : index
    %82 = vector.load %arg2[%c9, %c0_28, %c0_29] : memref<16x8x128xf32, #tpu.memory_space<vmem>>, vector<1x8x128xf32>
    %83 = vector.shape_cast %82 : vector<1x8x128xf32> to vector<8x128xf32>
    %84 = vector.shape_cast %81 : vector<8x128xf32> to vector<1x8x128xf32>
    tpu.vector_store %arg2[%c9, %c0_28, %c0_29], %84 {strides = array<i32>} : memref<16x8x128xf32, #tpu.memory_space<vmem>>, vector<1x8x128xf32>,
    %85 = arith.mulf %25, %80 : vector<8x128xf32>
    %86 = arith.subf %85, %74 : vector<8x128xf32>
    %87 = arith.mulf %86, %23 : vector<8x128xf32>
    %c10 = arith.constant 10 : index
    %c0_30 = arith.constant 0 : index
    %c0_31 = arith.constant 0 : index
    %88 = vector.load %arg2[%c10, %c0_30, %c0_31] : memref<16x8x128xf32, #tpu.memory_space<vmem>>, vector<1x8x128xf32>
    %89 = vector.shape_cast %88 : vector<1x8x128xf32> to vector<8x128xf32>
    %90 = vector.shape_cast %87 : vector<8x128xf32> to vector<1x8x128xf32>
    tpu.vector_store %arg2[%c10, %c0_30, %c0_31], %90 {strides = array<i32>} : memref<16x8x128xf32, #tpu.memory_space<vmem>>, vector<1x8x128xf32>,
    %91 = arith.mulf %25, %86 : vector<8x128xf32>
    %92 = arith.subf %91, %80 : vector<8x128xf32>
    %93 = arith.mulf %92, %23 : vector<8x128xf32>
    %c11 = arith.constant 11 : index
    %c0_32 = arith.constant 0 : index
    %c0_33 = arith.constant 0 : index
    %94 = vector.load %arg2[%c11, %c0_32, %c0_33] : memref<16x8x128xf32, #tpu.memory_space<vmem>>, vector<1x8x128xf32>
    %95 = vector.shape_cast %94 : vector<1x8x128xf32> to vector<8x128xf32>
    %96 = vector.shape_cast %93 : vector<8x128xf32> to vector<1x8x128xf32>
    tpu.vector_store %arg2[%c11, %c0_32, %c0_33], %96 {strides = array<i32>} : memref<16x8x128xf32, #tpu.memory_space<vmem>>, vector<1x8x128xf32>,
    %97 = arith.mulf %25, %92 : vector<8x128xf32>
    %98 = arith.subf %97, %86 : vector<8x128xf32>
    %99 = arith.mulf %98, %23 : vector<8x128xf32>
    %c12 = arith.constant 12 : index
    %c0_34 = arith.constant 0 : index
    %c0_35 = arith.constant 0 : index
    %100 = vector.load %arg2[%c12, %c0_34, %c0_35] : memref<16x8x128xf32, #tpu.memory_space<vmem>>, vector<1x8x128xf32>
    %101 = vector.shape_cast %100 : vector<1x8x128xf32> to vector<8x128xf32>
    %102 = vector.shape_cast %99 : vector<8x128xf32> to vector<1x8x128xf32>
    tpu.vector_store %arg2[%c12, %c0_34, %c0_35], %102 {strides = array<i32>} : memref<16x8x128xf32, #tpu.memory_space<vmem>>, vector<1x8x128xf32>,
    %103 = arith.mulf %25, %98 : vector<8x128xf32>
    %104 = arith.subf %103, %92 : vector<8x128xf32>
    %105 = arith.mulf %104, %23 : vector<8x128xf32>
    %c13 = arith.constant 13 : index
    %c0_36 = arith.constant 0 : index
    %c0_37 = arith.constant 0 : index
    %106 = vector.load %arg2[%c13, %c0_36, %c0_37] : memref<16x8x128xf32, #tpu.memory_space<vmem>>, vector<1x8x128xf32>
    %107 = vector.shape_cast %106 : vector<1x8x128xf32> to vector<8x128xf32>
    %108 = vector.shape_cast %105 : vector<8x128xf32> to vector<1x8x128xf32>
    tpu.vector_store %arg2[%c13, %c0_36, %c0_37], %108 {strides = array<i32>} : memref<16x8x128xf32, #tpu.memory_space<vmem>>, vector<1x8x128xf32>,
    %109 = arith.mulf %25, %104 : vector<8x128xf32>
    %110 = arith.subf %109, %98 : vector<8x128xf32>
    %111 = arith.mulf %110, %23 : vector<8x128xf32>
    %c14 = arith.constant 14 : index
    %c0_38 = arith.constant 0 : index
    %c0_39 = arith.constant 0 : index
    %112 = vector.load %arg2[%c14, %c0_38, %c0_39] : memref<16x8x128xf32, #tpu.memory_space<vmem>>, vector<1x8x128xf32>
    %113 = vector.shape_cast %112 : vector<1x8x128xf32> to vector<8x128xf32>
    %114 = vector.shape_cast %111 : vector<8x128xf32> to vector<1x8x128xf32>
    tpu.vector_store %arg2[%c14, %c0_38, %c0_39], %114 {strides = array<i32>} : memref<16x8x128xf32, #tpu.memory_space<vmem>>, vector<1x8x128xf32>,
    %115 = arith.mulf %25, %110 : vector<8x128xf32>
    %116 = arith.subf %115, %104 : vector<8x128xf32>
    %117 = arith.mulf %116, %23 : vector<8x128xf32>
    %c15 = arith.constant 15 : index
    %c0_40 = arith.constant 0 : index
    %c0_41 = arith.constant 0 : index
    %118 = vector.load %arg2[%c15, %c0_40, %c0_41] : memref<16x8x128xf32, #tpu.memory_space<vmem>>, vector<1x8x128xf32>
    %119 = vector.shape_cast %118 : vector<1x8x128xf32> to vector<8x128xf32>
    %120 = vector.shape_cast %117 : vector<8x128xf32> to vector<1x8x128xf32>
    tpu.vector_store %arg2[%c15, %c0_40, %c0_41], %120 {strides = array<i32>} : memref<16x8x128xf32, #tpu.memory_space<vmem>>, vector<1x8x128xf32>,
    return
  }
  func.func @transform_0(%arg0: i32) -> (i32, i32) {
    %c0_i32 = arith.constant 0 : i32
    %c0_i32_0 = arith.constant 0 : i32
    return %arg0, %c0_i32 : i32, i32
  }
  func.func @transform_1(%arg0: i32) -> (i32, i32, i32) {
    %c0_i32 = arith.constant 0 : i32
    %c0_i32_0 = arith.constant 0 : i32
    %c0_i32_1 = arith.constant 0 : i32
    return %c0_i32, %arg0, %c0_i32_0 : i32, i32, i32
  }
}

</mosaic_0001>

<bundles_post_ra>
// kernel: tpu_custom_call.1
= control target key start
LH: loop header
LB: loop body
LE: loop exit
PB: predicated region body
PF: predicated region fallthrough
CT: control target
= control target key end

     0   :  { %6 = vsyncpa [#allocation3], 0  ;;  %s502_s0 = inlined_call_operand.hbm [shape: f32[8,128], index: 0, kind: input, shape index: {}]   ;;  %s503_s1 = inlined_call_operand.hbm [shape: f32[16,8,128], index: 1, kind: output, shape index: {}]  }
   0x1   :  { %7 = vsyncpa [#allocation4], 0  ;;  %s414_s6 = smov [#allocation2]   ;;  %s366_s10 = scalar_lea.hbm %s502_s0, 128 }
   0x2   :  { %s14_s7 = sshll.u32 %s414_s6, 4  ;;  %p367_p0 = scmp.ne.s32.totalorder %s502_s0, %s366_s10  ;;  %s15_s7 = int_to_ptr.vmem [resolvable:$true] %s14_s7 }
   0x3   :  { %p370_p1 = scmp.lt.u32.totalorder %s366_s10, %s502_s0 }
   0x5   :  { %p372_p2 = pnand %p370_p1, %p367_p0 }
   0x7   :  { %375 = shalt.err (!%p372_p2)
}
   0x8   :  { %s376_s15 = scalar_lea.vmem %s15_s7, 128  ;;  %p381_p4 = scmp.lt.s32.totalorder %s15_s7, %s15_s7 }
   0x9   :  { %p377_p3 = scmp.ne.s32.totalorder %s15_s7, %s376_s15  ;;  %p382_p5 = scmp.lt.s32.totalorder %s376_s15, %s376_s15 }
   0xb   :  { %p383_p6 = por %p382_p5, %p381_p4 }
   0xd   :  { %p384_p7 = pnand %p383_p6, %p377_p3 }
   0xf   :  { %387 = shalt.err (!%p384_p7)
}
  0x10   :  { %17 = dma.hbm_to_vmem [thread:$0]  %s502_s0, 128, %s15_s7, [#allocation3]  }
  0x11   :  { %410 = dma.done.wait [#allocation3], 128  }
  0x12   :  { %411 = vsyncadd [#allocation3], 4294967168  ;;  %v447_v0 = vld [vmem:[#allocation2] sm:$0xff]  ;;  %v415_v13 = vmov 683565275   ;;  %s422_s0 = smov [#allocation5]  }
  0x13   :  { %v450_v1 = vmul.f32 0.62831855, %v447_v0  ;;  %v416_v15 = vmov 2475754826   ;;  %v417_v17 = vmov 2131351028  }
  0x14   :  { %v418_v19 = vmov 2102212464   ;;  %v419_v21 = vmov 920167782   ;;  %v420_v28 = vmov 1326507024  }
  0x15   :  { %v26_v2 = vand.u32 2139095040, %v450_v1  ;;  %v23_v4 = vand.u32 2147483647, %v450_v1  ;;  %vm25_vm7 = vcmp.lt.s32.totalorder %v450_v1, 0  ;;  %vm115_vm15 = vweird.f32 %v450_v1  ;;  %s324_s18 = sshll.u32 %s422_s0, 4  ;;  %s325_s18 = int_to_ptr.vmem [resolvable:$true] %s324_s18 }
  0x16   :  { %s388_s19 = scalar_lea.vmem %s325_s18, 2048  ;;  %p393_p9 = scmp.lt.s32.totalorder %s325_s18, %s325_s18 }
  0x17   :  { %v27_v3 = vshrl.u32 %v26_v2, 23  ;;  %v30_v7 = vand.u32 8388607, %v23_v4  ;;  %vm24_vm8 = vcmp.le.f32.partialorder %v23_v4, 0.7853982  ;;  %p389_p8 = scmp.ne.s32.totalorder %s325_s18, %s388_s19  ;;  %p394_p10 = scmp.lt.s32.totalorder %s388_s19, %s388_s19 }
  0x19   :  { %v336_v5 = vadd.s32 4294967169, %v27_v3  ;;  %v31_v10 = vor.u32 8388608, %v30_v7  ;;  %p395_p11 = por %p394_p10, %p393_p9 }
  0x1b   :  { %v33_v6 = vadd.s32 1, %v336_v5  ;;  %v71_v30 = vshll.u32 %v31_v10, 8  ;;  %p396_p12 = pnand %p395_p11, %p389_p8 }
  0x1d   :  { %vm34_vm0 = vcmp.gt.s32.totalorder %v33_v6, 0 }
  0x1e   :  { %v35_v8 = vsel %vm34_vm0, %v33_v6, 0  ;;  %vm230_vm0 = vcmp.lt.f32.partialorder %v447_v0, 5.0 }
  0x1f   :  { %v37_v9 = vand.u32 31, %v35_v8  ;;  %v36_v11 = vshrl.u32 %v35_v8, 5 }
  0x21   :  { %v38_v12 = vsub.s32 32, %v37_v9  ;;  %v40_v14 = vshll.u32 %v415_v13, %v37_v9  ;;  %v43_v16 = vshll.u32 %v416_v15, %v37_v9  ;;  %v46_v18 = vshll.u32 %v417_v17, %v37_v9 }
  0x22   :  { %v49_v20 = vshll.u32 %v418_v19, %v37_v9  ;;  %v52_v22 = vshll.u32 %v419_v21, %v37_v9  ;;  %vm55_vm1 = vcmp.lt.s32.totalorder %v36_v11, 1  ;;  %vm58_vm2 = vcmp.lt.s32.totalorder %v36_v11, 4 }
  0x23   :  { %v39_v23 = vshrl.u32 %v415_v13, %v38_v12  ;;  %v41_v24 = vshrl.u32 %v416_v15, %v38_v12  ;;  %v44_v25 = vshrl.u32 %v417_v17, %v38_v12  ;;  %v47_v26 = vshrl.u32 %v418_v19, %v38_v12 }
  0x24   :  { %v50_v27 = vshrl.u32 %v419_v21, %v38_v12  ;;  %v53_v29 = vshrl.u32 %v420_v28, %v38_v12  ;;  %vm56_vm3 = vcmp.lt.s32.totalorder %v36_v11, 2  ;;  %vm57_vm4 = vcmp.lt.s32.totalorder %v36_v11, 3 }
  0x25   :  { %v42_v31 = vor.u32 %v41_v24, %v40_v14  ;;  %v45_v32 = vor.u32 %v44_v25, %v43_v16  ;;  %v48_v33 = vor.u32 %v47_v26, %v46_v18  ;;  %v236_v17 = vadd.f32 1e-08, %v447_v0 }
  0x26   :  { %v51_v34 = vor.u32 %v50_v27, %v49_v20  ;;  %v54_v35 = vor.u32 %v53_v29, %v52_v22 }
  0x27   :  { %v59_v36 = vsel %vm55_vm1, %v39_v23, %v42_v31  ;;  %v60_v37 = vsel %vm58_vm2, %v48_v33, 2102212464  ;;  %v63_v38 = vsel %vm55_vm1, %v42_v31, %v45_v32  ;;  %v67_v39 = vsel %vm55_vm1, %v45_v32, %v48_v33 }
  0x28   :  { %v61_v40 = vsel %vm57_vm4, %v45_v32, %v60_v37  ;;  %v64_v41 = vsel %vm58_vm2, %v51_v34, 920167782  ;;  %v68_v42 = vsel %vm58_vm2, %v54_v35, 1326507024  ;;  %360 = vrcp.f32 %v236_v17 }
  0x29   :  { %v65_v43 = vsel %vm57_vm4, %v48_v33, %v64_v41  ;;  %v69_v44 = vsel %vm57_vm4, %v51_v34, %v68_v42  ;;  %v62_v45 = vsel %vm56_vm3, %v59_v36, %v61_v40  ;;  %v421_v42 = vmov 0.0  }
  0x2a   :  { %v66_v46 = vsel %vm56_vm3, %v63_v38, %v65_v43  ;;  %v70_v47 = vsel %vm56_vm3, %v67_v39, %v69_v44  ;;  %v78_v52 = vmul.u32 %v71_v30, %v62_v45  ;;  %v344_v43 = vsel %vm230_vm0, 1.0, %v421_v42 }
  0x2b   :  { %v456_v48 = vmul.u32.u64.low %v71_v30, %v70_v47  ;;  %v457_v49 = vmul.u32.u64.high %v71_v30, %v70_v47, %v456_v48  ;;  %v459_v50 = vmul.u32.u64.low %v71_v30, %v66_v46  ;;  %v460_v51 = vmul.u32.u64.high %v71_v30, %v66_v46, %v459_v50 }
  0x2d   :  { %vm80_vm5 = vc.u32 %v457_v49, %v459_v50  ;;  %v81_v53 = vadd.s32 1, %v460_v51  ;;  %v79_v2 = vadd.s32 %v459_v50, %v457_v49 }
  0x2f   :  { %v82_v54 = vsel %vm80_vm5, %v81_v53, %v460_v51 }
  0x30   :  { %v83_v55 = vadd.s32 %v82_v54, %v78_v52 }
  0x32   :  { %v84_v56 = vadd.s32 536870912, %v83_v55  ;;  %v361_v26 = vpop.eup %360 }
  0x33   :  { %v238_v4 = vmul.f32 %v361_v26, %v236_v17 }
  0x34   :  { %v85_v57 = vshrl.u32 %v84_v56, 30 }
  0x35   :  { %v239_v37 = vsub.f32 2.0, %v238_v4 }
  0x36   :  { %v86_v58 = vshll.u32 %v85_v57, 30  ;;  %v109_v15 = vsub.s32 4, %v85_v57 }
  0x37   :  { %v240_v45 = vmul.f32 %v361_v26, %v239_v37 }
  0x38   :  { %v87_v59 = vsub.s32 %v83_v55, %v86_v58  ;;  %v110_v19 = vsel %vm25_vm7, %v109_v15, %v85_v57 }
  0x39   :  { %v112_v22 = vsel %vm24_vm8, 0, %v110_v19 }
  0x3a   :  { %v89_v60 = vsub.s32 0, %v87_v59  ;;  %v219_v23 = vadd.s32 3, %v112_v22  ;;  %v116_v24 = vand.u32 3, %v112_v22 }
  0x3c   :  { %v337_v61 = vmin.u32 %v89_v60, %v87_v59  ;;  %v220_v25 = vand.u32 3, %v219_v23  ;;  %vm121_vm9 = vcmp.eq.s32.totalorder %v116_v24, 2  ;;  %vm118_vm11 = vcmp.eq.s32.totalorder %v116_v24, 0 }
  0x3d   :  { %vm117_vm13 = vcmp.lt.s32.totalorder %v116_v24, 2 }
  0x3e   :  { %v91_v62 = vclz %v337_v61  ;;  %vm225_vm10 = vcmp.eq.s32.totalorder %v220_v25, 2  ;;  %vm222_vm12 = vcmp.eq.s32.totalorder %v220_v25, 0  ;;  %vm221_vm14 = vcmp.lt.s32.totalorder %v220_v25, 2 }
  0x40   :  { %v338_v63 = vadd.s32 4294967294, %v91_v62 }
  0x42   :  { %vm339_vm6 = vcmp.lt.s32.totalorder %v338_v63, 0 }
  0x43   :  { %v94_v3 = vsel %vm339_vm6, 0, %v338_v63 }
  0x44   :  { %v95_v5 = vsub.s32 32, %v94_v3  ;;  %v96_v6 = vshll.u32 %v87_v59, %v94_v3  ;;  %v99_v7 = vsub.s32 4294967266, %v94_v3 }
  0x46   :  { %v97_v8 = vshrl.u32 %v79_v2, %v95_v5  ;;  %v100_v9 = vadd.s32 127, %v99_v7 }
  0x48   :  { %v98_v10 = vor.u32 %v97_v8, %v96_v6  ;;  %v101_v11 = vshll.u32 %v100_v9, 23 }
  0x4a   :  { %v102_v12 = vor.u32 4788187, %v101_v11  ;;  %v105_v13 = vcvt.s32.f32 %v98_v10 }
  0x4c   :  { %v103_v14 = vand.u32 2147483647, %v102_v12 }
  0x4e   :  { %v106_v16 = vmul.f32 %v105_v13, %v103_v14 }
  0x50   :  { %v107_v18 = vxor.u32 2147483648, %v106_v16 }
  0x52   :  { %v108_v20 = vsel %vm25_vm7, %v107_v18, %v106_v16 }
  0x53   :  { %v111_v21 = vsel %vm24_vm8, %v450_v1, %v108_v20 }
  0x54   :  { %362 = vcosq.f32 %v111_v21 }
  0x55   :  { %364 = vsinq.f32 %v111_v21 }
  0x5e   :  { %v363_v27 = vpop.eup %362 }
  0x5f   :  { %v365_v28 = vpop.eup %364  ;;  %v122_v29 = vxor.u32 2147483648, %v363_v27 }
  0x60   :  { %v119_v30 = vxor.u32 2147483648, %v365_v28 }
  0x61   :  { %v123_v31 = vsel %vm121_vm9, %v122_v29, %v365_v28  ;;  %v227_v32 = vsel %vm225_vm10, %v122_v29, %v365_v28 }
  0x62   :  { %v120_v33 = vsel %vm118_vm11, %v363_v27, %v119_v30  ;;  %v224_v34 = vsel %vm222_vm12, %v363_v27, %v119_v30 }
  0x63   :  { %v124_v35 = vsel %vm117_vm13, %v120_v33, %v123_v31  ;;  %v228_v36 = vsel %vm221_vm14, %v224_v34, %v227_v32 }
  0x64   :  { %v125_v38 = vsel %vm115_vm15, nan, %v124_v35  ;;  %v229_v39 = vsel %vm115_vm15, nan, %v228_v36 }
  0x65   :  { %v233_v40 = vadd.f32 1.0, %v125_v38  ;;  %v473_v41 = vmul.f32 2.0, %v125_v38 }
  0x67   :  { %v234_v44 = vmul.f32 0.5, %v233_v40  ;;  %v245_v1 = vmul.f32 %v473_v41, %v229_v39 }
  0x69   :  { %v235_v46 = vmul.f32 %v344_v43, %v234_v44  ;;  %v249_v47 = vmul.f32 %v245_v1, %v473_v41 }
  0x6b   :  { %v241_v48 = vmul.f32 %v240_v45, %v235_v46  ;;  %v250_v49 = vsub.f32 %v249_v47, %v229_v39 }
  0x6d   :  { %v243_v50 = vmul.f32 %v241_v48, %v229_v39  ;;  %v246_v51 = vmul.f32 %v245_v1, %v241_v48  ;;  %v251_v0 = vmul.f32 %v250_v49, %v241_v48  ;;  %v254_v52 = vmul.f32 %v250_v49, %v473_v41 }
  0x6f   :  { %244 = vst [vmem:[#allocation5] sm:$0xff] %v243_v50  ;;  %248 = vst [vmem:[#allocation5 + $0x8] sm:$0xff] %v246_v51  ;;  %v255_v53 = vsub.f32 %v254_v52, %v245_v1 }
  0x70   :  { %253 = vst [vmem:[#allocation5 + $0x10] sm:$0xff] %v251_v0 }
  0x71   :  { %v256_v54 = vmul.f32 %v255_v53, %v241_v48  ;;  %v259_v55 = vmul.f32 %v255_v53, %v473_v41 }
  0x73   :  { %258 = vst [vmem:[#allocation5 + $0x18] sm:$0xff] %v256_v54  ;;  %v260_v56 = vsub.f32 %v259_v55, %v250_v49 }
  0x75   :  { %v261_v57 = vmul.f32 %v260_v56, %v241_v48  ;;  %v264_v58 = vmul.f32 %v260_v56, %v473_v41 }
  0x77   :  { %263 = vst [vmem:[#allocation5 + $0x20] sm:$0xff] %v261_v57  ;;  %v265_v59 = vsub.f32 %v264_v58, %v255_v53 }
  0x79   :  { %v266_v60 = vmul.f32 %v265_v59, %v241_v48  ;;  %v269_v61 = vmul.f32 %v265_v59, %v473_v41 }
  0x7b   :  { %268 = vst [vmem:[#allocation5 + $0x28] sm:$0xff] %v266_v60  ;;  %v270_v62 = vsub.f32 %v269_v61, %v260_v56 }
  0x7d   :  { %v271_v63 = vmul.f32 %v270_v62, %v241_v48  ;;  %v274_v2 = vmul.f32 %v270_v62, %v473_v41 }
  0x7f   :  { %273 = vst [vmem:[#allocation5 + $0x30] sm:$0xff] %v271_v63  ;;  %v275_v3 = vsub.f32 %v274_v2, %v265_v59 }
  0x81   :  { %v276_v5 = vmul.f32 %v275_v3, %v241_v48  ;;  %v279_v6 = vmul.f32 %v275_v3, %v473_v41 }
  0x83   :  { %278 = vst [vmem:[#allocation5 + $0x38] sm:$0xff] %v276_v5  ;;  %v280_v7 = vsub.f32 %v279_v6, %v270_v62 }
  0x85   :  { %v281_v8 = vmul.f32 %v280_v7, %v241_v48  ;;  %v284_v9 = vmul.f32 %v280_v7, %v473_v41 }
  0x87   :  { %283 = vst [vmem:[#allocation5 + $0x40] sm:$0xff] %v281_v8  ;;  %v285_v10 = vsub.f32 %v284_v9, %v275_v3 }
  0x89   :  { %v286_v11 = vmul.f32 %v285_v10, %v241_v48  ;;  %v289_v12 = vmul.f32 %v285_v10, %v473_v41 }
  0x8b   :  { %288 = vst [vmem:[#allocation5 + $0x48] sm:$0xff] %v286_v11  ;;  %v290_v13 = vsub.f32 %v289_v12, %v280_v7 }
  0x8d   :  { %v291_v14 = vmul.f32 %v290_v13, %v241_v48  ;;  %v294_v15 = vmul.f32 %v290_v13, %v473_v41 }
  0x8f   :  { %293 = vst [vmem:[#allocation5 + $0x50] sm:$0xff] %v291_v14  ;;  %v295_v16 = vsub.f32 %v294_v15, %v285_v10 }
  0x91   :  { %v296_v17 = vmul.f32 %v295_v16, %v241_v48  ;;  %v299_v18 = vmul.f32 %v295_v16, %v473_v41 }
  0x93   :  { %298 = vst [vmem:[#allocation5 + $0x58] sm:$0xff] %v296_v17  ;;  %v300_v19 = vsub.f32 %v299_v18, %v290_v13 }
  0x95   :  { %v301_v20 = vmul.f32 %v300_v19, %v241_v48  ;;  %v304_v21 = vmul.f32 %v300_v19, %v473_v41 }
  0x97   :  { %303 = vst [vmem:[#allocation5 + $0x60] sm:$0xff] %v301_v20  ;;  %v305_v22 = vsub.f32 %v304_v21, %v295_v16 }
  0x99   :  { %v306_v23 = vmul.f32 %v305_v22, %v241_v48  ;;  %v309_v24 = vmul.f32 %v305_v22, %v473_v41 }
  0x9b   :  { %308 = vst [vmem:[#allocation5 + $0x68] sm:$0xff] %v306_v23  ;;  %v310_v25 = vsub.f32 %v309_v24, %v300_v19 }
  0x9d   :  { %v311_v26 = vmul.f32 %v310_v25, %v241_v48  ;;  %v314_v27 = vmul.f32 %v310_v25, %v473_v41 }
  0x9f   :  { %313 = vst [vmem:[#allocation5 + $0x70] sm:$0xff] %v311_v26  ;;  %v315_v28 = vsub.f32 %v314_v27, %v305_v22 }
  0xa1   :  { %v316_v29 = vmul.f32 %v315_v28, %v241_v48 }
  0xa3   :  { %318 = vst [vmem:[#allocation5 + $0x78] sm:$0xff] %v316_v29 }
  0xa4   :  { %399 = shalt.err (!%p396_p12)
}
  0xa5   :  { %s400_s22 = scalar_lea.hbm %s503_s1, 2048 }
  0xa6   :  { %p401_p13 = scmp.ne.s32.totalorder %s503_s1, %s400_s22  ;;  %p404_p0 = scmp.lt.u32.totalorder %s400_s22, %s503_s1 }
  0xa8   :  { %p406_p1 = pnand %p404_p0, %p401_p13 }
  0xaa   :  { %409 = shalt.err (!%p406_p1)
}
  0xab   :  { %s423_s27 = smov 128   ;;  %s424_s28 = smov 8  }
  0xac   :  { %330 = dma.vmem_to_hbm [thread:$0]  %s325_s18, 2048, %s503_s1, [#allocation4], %s423_s27, %s423_s27, %s424_s28  }
  0xad   :  { %412 = dma.done.wait [#allocation4], 2048  }
  0xae   :  { %413 = vsyncadd [#allocation4], 4294965248 }
  0xaf   :  { %334 = vsyncpa [#allocation3], 1 }
  0xb0   :  { %335 = vsyncpa [#allocation4], 1 }

</bundles_post_ra>
